<compile_context>
chip_gen: v7x
topology: tpu7x:2x2x1
jax: 0.10.0
libtpu: 0.0.40
codegen_flags: <defaults>
</compile_context>

<pallas_src>
import jax
import jax.numpy as jnp
from jax.experimental import pallas as pl
from jax.experimental.pallas import tpu as pltpu


def _round_up(x, m):
    return ((x + m - 1) // m) * m


def _pose_pred_kernel(x_ref, w_ref, b_ref, o_ref):
    # x_ref: (TM, E), w_ref: (E, N), b_ref: (1, N), o_ref: (TM, N)
    acc = jnp.dot(x_ref[...], w_ref[...], preferred_element_type=jnp.float32)
    o_ref[...] = (acc + b_ref[...]).astype(o_ref.dtype)


def pose_prediction(x, weight, bias, *,
                    compute_dtype=jnp.bfloat16,
                    tm_target=2048,
                    min_pallas_rows=1024):
    """
    x:      (B, L, E)   (what the PyTorch forward receives before its transpose)
    weight: (n_out, E)  (PyTorch Conv1d weight squeezed over the kernel dim)
    bias:   (n_out,)
    compute_dtype: MXU input dtype (default bf16, f32 accumulation); None = x.dtype.
    tm_target: row-tile size; 2048 is safe on all generations, 4096-8192 pays on v7x.
    min_pallas_rows: below this many rows use a plain einsum (launch overhead wins).
    returns (B, L, n_out) in x.dtype
    """
    B, L, E = x.shape
    n_out = weight.shape[0]
    out_dtype = x.dtype
    M = B * L

    # Small-M fast path: the pallas_call is pure fixed overhead at inference sizes.
    if M < min_pallas_rows:
        return (jnp.einsum("ble,ne->bln", x, weight)
                + bias[None, None, :]).astype(out_dtype)

    # Flatten (B, L) -> M rows; reshape is free (contiguous), no padding passes.
    x2d = x.reshape(M, E)
    w_t = weight.T                                   # (E, n_out)
    b2d = bias.reshape(1, n_out).astype(jnp.float32)  # bias add stays f32

    if compute_dtype is not None:
        x2d = x2d.astype(compute_dtype)
        w_t = w_t.astype(compute_dtype)

    # Row tile: multiple of 8, at most tm_target; boundary block may be partial.
    tm = min(tm_target, _round_up(M, 8))
    tm = _round_up(tm, 8)
    grid = (pl.cdiv(M, tm),)

    out_itemsize = jnp.dtype(out_dtype).itemsize
    cost = pl.CostEstimate(
        flops=2 * M * E * n_out,
        transcendentals=0,
        bytes_accessed=(x2d.size * x2d.dtype.itemsize
                        + w_t.size * w_t.dtype.itemsize
                        + b2d.size * b2d.dtype.itemsize
                        + M * n_out * out_itemsize),
    )

    out2d = pl.pallas_call(
        _pose_pred_kernel,
        out_shape=jax.ShapeDtypeStruct((M, n_out), out_dtype),
        grid_spec=pltpu.PrefetchScalarGridSpec(
            num_scalar_prefetch=0,
            grid=grid,
            in_specs=[
                # x: tiled over rows, double-buffered by the pipeline.
                pl.BlockSpec((tm, E), lambda i: (i, 0)),
                # weight / bias: constant block index -> no re-DMA, stay resident.
                pl.BlockSpec((E, n_out), lambda i: (0, 0)),
                pl.BlockSpec((1, n_out), lambda i: (0, 0)),
            ],
            # Un-padded output: full n_out on the lane axis, no slice pass afterwards.
            out_specs=pl.BlockSpec((tm, n_out), lambda i: (i, 0)),
        ),
        compiler_params=pltpu.CompilerParams(
            dimension_semantics=("parallel",),
        ),
        cost_estimate=cost,
    )(x2d, w_t, b2d)

    return out2d.reshape(B, L, n_out)


def _reference(x, weight, bias):
    # pure-JAX reference of the PyTorch forward
    return jnp.einsum("ble,ne->bln", x, weight) + bias[None, None, :]


if __name__ == "__main__":
    # Module hyperparameters (consistent with the PyTorch defaults)
    embedding_size = 128
    n_out = 51
    input_len = 10
    batch = 2

    key = jax.random.PRNGKey(0)
    kx, kw, kb = jax.random.split(key, 3)

    # Conv1d weight is (n_out, E, 1) -> squeeze the kernel dim
    weight = jax.random.normal(kw, (n_out, embedding_size), dtype=jnp.float32) * 0.02
    bias = jax.random.normal(kb, (n_out,), dtype=jnp.float32) * 0.01
    x = jax.random.normal(kx, (batch, input_len, embedding_size), dtype=jnp.float32)

    ref = _reference(x, weight, bias)

    # 1) f32 Pallas path (exact), forced through the kernel even at tiny M.
    out_f32 = jax.block_until_ready(
        pose_prediction(x, weight, bias, compute_dtype=None, min_pallas_rows=0))
    assert out_f32.shape == (batch, input_len, n_out), out_f32.shape
    assert jnp.allclose(out_f32, ref, atol=1e-4, rtol=1e-4), \
        float(jnp.max(jnp.abs(out_f32 - ref)))

    # 2) default bf16-compute Pallas path (f32 accumulation) -- looser tolerance.
    out_bf16 = jax.block_until_ready(
        pose_prediction(x, weight, bias, min_pallas_rows=0))
    assert jnp.allclose(out_bf16, ref, atol=2e-2, rtol=2e-2), \
        float(jnp.max(jnp.abs(out_bf16 - ref)))

    # 3) small-M fast path (auto-selected einsum) matches the reference.
    out_fast = jax.block_until_ready(
        pose_prediction(x, weight, bias, compute_dtype=None))
    assert jnp.allclose(out_fast, ref, atol=1e-5, rtol=1e-5)

    print("KERNEL_OK")
</pallas_src>

<mosaic_0001>
module attributes {stable_mosaic.version = 11 : i64} {
  func.func @_pose_pred_kernel(%arg0: i32, %arg1: memref<24x128xf32, #tpu.memory_space<vmem>>, %arg2: memref<128x51xf32, #tpu.memory_space<vmem>>, %arg3: memref<1x51xf32, #tpu.memory_space<vmem>>, %arg4: memref<24x51xf32, #tpu.memory_space<vmem>>) attributes {dimension_semantics = [#tpu.dimension_semantics<parallel>], iteration_bounds = array<i64: 1>, scalar_prefetch = 0 : i64, scratch_operands = 0 : i64, tpu.core_type = #tpu.core_type<tc>, window_params = [{transform_indices = @transform_0, window_bounds = array<i64: 24, 128>}, {pipeline_mode = #tpu.pipeline_mode<synchronous>, transform_indices = @transform_1, window_bounds = array<i64: 128, 51>}, {pipeline_mode = #tpu.pipeline_mode<synchronous>, transform_indices = @transform_2, window_bounds = array<i64: 1, 51>}, {transform_indices = @transform_3, window_bounds = array<i64: 24, 51>}]} {
    %c0 = arith.constant 0 : index
    %c0_0 = arith.constant 0 : index
    %0 = vector.load %arg1[%c0, %c0_0] : memref<24x128xf32, #tpu.memory_space<vmem>>, vector<24x128xf32>
    %c0_1 = arith.constant 0 : index
    %c0_2 = arith.constant 0 : index
    %1 = vector.load %arg2[%c0_1, %c0_2] : memref<128x51xf32, #tpu.memory_space<vmem>>, vector<128x51xf32>
    %cst = arith.constant dense<0.000000e+00> : vector<24x51xf32>
    %2 = tpu.matmul %0, %1, %cst {dimension_numbers = #tpu.dot_dimension_numbers<[1], [0], [0], [1], [0, 0, 1, 1], [], []>} : vector<24x128xf32>, vector<128x51xf32>, vector<24x51xf32> -> vector<24x51xf32>
    %c0_3 = arith.constant 0 : index
    %c0_4 = arith.constant 0 : index
    %3 = vector.load %arg3[%c0_3, %c0_4] : memref<1x51xf32, #tpu.memory_space<vmem>>, vector<1x51xf32>
    %4 = vector.broadcast %3 : vector<1x51xf32> to vector<24x51xf32>
    %5 = arith.addf %2, %4 : vector<24x51xf32>
    %c0_5 = arith.constant 0 : index
    %c0_6 = arith.constant 0 : index
    %6 = vector.load %arg4[%c0_5, %c0_6] : memref<24x51xf32, #tpu.memory_space<vmem>>, vector<24x51xf32>
    tpu.vector_store %arg4[%c0_5, %c0_6], %5 {strides = array<i32>} : memref<24x51xf32, #tpu.memory_space<vmem>>, vector<24x51xf32>,
    return
  }
  func.func @transform_0(%arg0: i32) -> (i32, i32) {
    %c0_i32 = arith.constant 0 : i32
    %c0_i32_0 = arith.constant 0 : i32
    return %arg0, %c0_i32 : i32, i32
  }
  func.func @transform_1(%arg0: i32) -> (i32, i32) {
    %c0_i32 = arith.constant 0 : i32
    %c0_i32_0 = arith.constant 0 : i32
    %c0_i32_1 = arith.constant 0 : i32
    return %c0_i32, %c0_i32_0 : i32, i32
  }
  func.func @transform_2(%arg0: i32) -> (i32, i32) {
    %c0_i32 = arith.constant 0 : i32
    %c0_i32_0 = arith.constant 0 : i32
    %c0_i32_1 = arith.constant 0 : i32
    return %c0_i32, %c0_i32_0 : i32, i32
  }
  func.func @transform_3(%arg0: i32) -> (i32, i32) {
    %c0_i32 = arith.constant 0 : i32
    %c0_i32_0 = arith.constant 0 : i32
    return %arg0, %c0_i32 : i32, i32
  }
}

</mosaic_0001>

<bundles_post_ra>
// kernel: tpu_custom_call.1
= control target key start
LH: loop header
LB: loop body
LE: loop exit
PB: predicated region body
PF: predicated region fallthrough
CT: control target
= control target key end

     0   :  { %v272_v3 = vmov 0.0|0.0   ;;  %vm273_vm0 = vmmov 0   ;;  %v274_v6 = vmov 0.0   ;;  %s373_s0 = inlined_call_operand.vmem [shape: f32[20,128], index: 0, kind: input, shape index: {}]   ;;  %s374_s1 = inlined_call_operand.vmem [shape: f32[128,51], index: 1, kind: input, shape index: {}]   ;;  %s375_s2 = inlined_call_operand.vmem [shape: f32[1,51], index: 2, kind: input, shape index: {}]   ;;  %s376_s3 = inlined_call_operand.hbm [shape: f32[20,51], index: 3, kind: output, shape index: {}]  }
   0x1   :  { %v18_v0 = vld [vmem:[%s374_s1] sm:$0xff]  ;;  %v19_v1 = vld [vmem:[%s374_s1 + $0x8] sm:$0xff]  ;;  %v20_v2 = vld [vmem:[%s374_s1 + $0x10] sm:$0xff]  ;;  %226 = vmatprep.subr.bf16.mxu1 %v272_v3  ;;  %202 = vmatprep.subr.bf16.mxu0 %v272_v3 }
   0x2   :  { %v203_v4 = vpack.c.bf16 %v19_v1, %v18_v0  ;;  %v21_v5 = vld [vmem:[%s374_s1 + $0x18] sm:$0xff]  ;;  %196 = vmatprep.mubr.msk.f32.mxu1 %vm273_vm0, %v274_v6  ;;  %193 = vmatprep.mubr.msk.f32.mxu0 %vm273_vm0, %v274_v6  ;;  %v22_v8 = vld [vmem:[%s374_s1 + $0x20] sm:$0xff]  ;;  %v23_v9 = vld [vmem:[%s374_s1 + $0x28] sm:$0xff] }
   0x3   :  { %v206_v7 = vpack.c.bf16 %v21_v5, %v20_v2 }
   0x4   :  { %234 = vmatpush3.bf16.msra.mxu1 %v203_v4  ;;  %204 = vmatpush3.bf16.msra.mxu0 %v203_v4 }
   0x5   :  { %227 = vmatprep.subr.bf16.mxu1 %v272_v3  ;;  %205 = vmatprep.subr.bf16.mxu0 %v272_v3 }
   0x6   :  { %8 = vsyncpa [#allocation3], 0  ;;  %v209_v10 = vpack.c.bf16 %v23_v9, %v22_v8  ;;  %v24_v11 = vld [vmem:[%s374_s1 + $0x30] sm:$0xff]  ;;  %v25_v12 = vld [vmem:[%s374_s1 + $0x38] sm:$0xff]  ;;  %vm121_vm1 = vcmask 416768   ;;  %s275_s24 = smov [#allocation2]  }
   0x7   :  { %v212_v13 = vpack.c.bf16 %v25_v12, %v24_v11  ;;  %v26_v14 = vld [vmem:[%s374_s1 + $0x40] sm:$0xff]  ;;  %v27_v15 = vld [vmem:[%s374_s1 + $0x48] sm:$0xff]  ;;  %v28_v17 = vld [vmem:[%s374_s1 + $0x50] sm:$0xff]  ;;  %s130_s25 = sshll.u32 %s275_s24, 4  ;;  %s131_s25 = int_to_ptr.vmem [resolvable:$true] %s130_s25 }
   0x8   :  { %235 = vmatpush3.bf16.msra.mxu1 %v206_v7  ;;  %207 = vmatpush3.bf16.msra.mxu0 %v206_v7  ;;  %v215_v16 = vpack.c.bf16 %v27_v15, %v26_v14  ;;  %v29_v18 = vld [vmem:[%s374_s1 + $0x58] sm:$0xff]  ;;  %v30_v20 = vld [vmem:[%s374_s1 + $0x60] sm:$0xff]  ;;  %v31_v21 = vld [vmem:[%s374_s1 + $0x68] sm:$0xff]  ;;  %p253_p1 = scmp.lt.s32.totalorder %s131_s25, %s131_s25 }
   0x9   :  { %228 = vmatprep.subr.bf16.mxu1 %v272_v3  ;;  %208 = vmatprep.subr.bf16.mxu0 %v272_v3  ;;  %v218_v19 = vpack.c.bf16 %v29_v18, %v28_v17  ;;  %v221_v22 = vpack.c.bf16 %v31_v21, %v30_v20  ;;  %v32_v23 = vld [vmem:[%s374_s1 + $0x70] sm:$0xff]  ;;  %v33_v24 = vld [vmem:[%s374_s1 + $0x78] sm:$0xff]  ;;  %v16_v26 = vld [vmem:[%s373_s0 + $0x8] sm:$0xff] }
   0xa   :  { %v224_v25 = vpack.c.bf16 %v33_v24, %v32_v23  ;;  %v15_v27 = vld [vmem:[%s373_s0] sm:$0xff]  ;;  %v17_v28 = vld [vmem:[%s373_s0 + $0x10] sm:$0xff]  ;;  %s248_s0 = scalar_lea.vmem %s131_s25, 384 }
   0xb   :  { %v141_v29 = vld [vmem:[%s375_s2] ss:$0 sm:$0xff]  ;;  %p249_p0 = scmp.ne.s32.totalorder %s131_s25, %s248_s0  ;;  %p254_p2 = scmp.lt.s32.totalorder %s248_s0, %s248_s0 }
   0xc   :  { %236 = vmatpush3.bf16.msra.mxu1 %v209_v10  ;;  %210 = vmatpush3.bf16.msra.mxu0 %v209_v10 }
   0xd   :  { %229 = vmatprep.subr.bf16.mxu1 %v272_v3  ;;  %211 = vmatprep.subr.bf16.mxu0 %v272_v3  ;;  %p255_p3 = por %p254_p2, %p253_p1 }
   0xf   :  { %p256_p4 = pnand %p255_p3, %p249_p0 }
  0x10   :  { %237 = vmatpush3.bf16.msra.mxu1 %v212_v13  ;;  %213 = vmatpush3.bf16.msra.mxu0 %v212_v13 }
  0x11   :  { %230 = vmatprep.subr.bf16.mxu1 %v272_v3  ;;  %214 = vmatprep.subr.bf16.mxu0 %v272_v3 }
  0x14   :  { %238 = vmatpush3.bf16.msra.mxu1 %v215_v16  ;;  %216 = vmatpush3.bf16.msra.mxu0 %v215_v16 }
  0x15   :  { %231 = vmatprep.subr.bf16.mxu1 %v272_v3  ;;  %217 = vmatprep.subr.bf16.mxu0 %v272_v3 }
  0x18   :  { %239 = vmatpush3.bf16.msra.mxu1 %v218_v19  ;;  %219 = vmatpush3.bf16.msra.mxu0 %v218_v19 }
  0x19   :  { %232 = vmatprep.subr.bf16.mxu1 %v272_v3  ;;  %220 = vmatprep.subr.bf16.mxu0 %v272_v3 }
  0x1c   :  { %240 = vmatpush3.bf16.msra.mxu1 %v221_v22  ;;  %222 = vmatpush3.bf16.msra.mxu0 %v221_v22 }
  0x1d   :  { %233 = vmatprep.subr.bf16.mxu1 %v272_v3  ;;  %223 = vmatprep.subr.bf16.mxu0 %v272_v3 }
  0x20   :  { %241 = vmatpush3.bf16.msra.mxu1 %v224_v25  ;;  %225 = vmatpush3.bf16.msra.mxu0 %v224_v25 }
  0x23   :  { %197 = vmatmul.mubr.f32.vlgmr.msra.gmra.mrb[0].mxu1 %v16_v26  ;;  %194 = vmatmul.mubr.f32.vlgmr.msra.gmra.mrb[0].mxu0 %v15_v27 }
  0x24   :  { %199 = vmatprep.mubr.msk.f32.mxu1 %vm273_vm0, %v274_v6 }
  0x27   :  { %200 = vmatmul.mubr.f32.gmra.mrb[2].mxu1 %v17_v28 }
  0xf6   :  { %v112_v30 = vpop.f32.mrb[0].mxu1  ;;  %v107_v31 = vpop.f32.mrb[0].mxu0 }
  0xf7   :  { %v113_v32 = vadd.f32 %v141_v29, %v112_v30  ;;  %v198_v33 = vpop.f32.mrb[1].mxu1  ;;  %v108_v34 = vadd.f32 %v141_v29, %v107_v31  ;;  %v195_v35 = vpop.f32.mrb[1].mxu0 }
  0xf9   :  { %123 = vst.msk [vmem:[#allocation2 + $0x8] sm:$0xff] %vm121_vm1, %v113_v32  ;;  %122 = vst.msk [vmem:[#allocation2] sm:$0xff] %vm121_vm1, %v108_v34 }
  0xfa   :  { %v117_v36 = vpop.f32.mrb[2].mxu1 }
  0xfb   :  { %v118_v37 = vadd.f32 %v141_v29, %v117_v36  ;;  %v201_v38 = vpop.f32.mrb[3].mxu1 }
  0xfd   :  { %124 = vst.msk [vmem:[#allocation2 + $0x10] sm:$0xff] %vm121_vm1, %v118_v37 }
  0xfe   :  { %259 = shalt.err (!%p256_p4)
}
  0xff   :  { %s260_s27 = scalar_lea.hbm %s376_s3, 384 }
 0x100   :  { %p261_p5 = scmp.ne.s32.totalorder %s376_s3, %s260_s27  ;;  %p264_p6 = scmp.lt.u32.totalorder %s260_s27, %s376_s3 }
 0x102   :  { %p266_p7 = pnand %p264_p6, %p261_p5 }
 0x104   :  { %269 = shalt.err (!%p266_p7)
}
 0x105   :  { %s276_s5 = smov 128   ;;  %s277_s6 = smov 8  }
 0x106   :  { %136 = dma.vmem_to_hbm [thread:$0]  %s131_s25, 384, %s376_s3, [#allocation3], %s276_s5, %s276_s5, %s277_s6  }
 0x107   :  { %270 = dma.done.wait [#allocation3], 384  }
 0x108   :  { %271 = vsyncadd [#allocation3], 4294966912 }
 0x109   :  { %140 = vsyncpa [#allocation3], 1 }

</bundles_post_ra>
